<compile_context>
chip_gen: v7x
topology: tpu7x:2x2x1
jax: 0.10.0
libtpu: 0.0.40
codegen_flags: <defaults>
</compile_context>

<pallas_src>
import functools

import numpy as np
import jax
import jax.numpy as jnp
from jax.experimental import pallas as pl
from jax.experimental.pallas import tpu as pltpu

# ----- hyper-parameters: CNN1D(input_channel=C, hidden_channel=C, kernel=K,
#                               dilation=1, stride=1, ds=2)
B, C, T = 2, 8, 16
K = 3
DIL = 1
DS = 2
DIL2 = DIL * DS
PAD1 = (K - 1) // 2 * DIL            # = 1
PAD2 = (K - 1) // 2 * DIL2           # = 2
EPS = 1e-16

CP = 128                             # channels padded to a full lane width
EXTPAD = ((PAD2 + 3) // 4) * 4       # = 4  halo so extended time range is 8-aligned
EXT = T + 2 * EXTPAD                 # = 24 per-batch extended time range
ROWS = B * EXT                       # = 48 rows of every 2-D tile in the kernel
N_REAL = B * T                       # = 32 rows holding real time steps

assert EXT % 8 == 0 and EXTPAD >= PAD2 and EXTPAD >= PAD1


def _cnn1d_kernel(x_ref, w_ref, p_ref, out_ref):
    """x_ref  : (ROWS, CP)     flattened (batch, halo-extended time) input, zero halo
       w_ref  : (2*K, CP, CP)  per-tap weights, w_ref[layer*K + k][i, o]
       p_ref  : (8, CP)        rows = b1, g1, be1, b2, g2, be2, 0, 0
       out_ref: (ROWS, CP)     extended-time output (wrapper keeps real rows)
    """
    b1, g1, be1 = p_ref[0:1, :], p_ref[1:2, :], p_ref[2:3, :]
    b2, g2, be2 = p_ref[3:4, :], p_ref[4:5, :], p_ref[5:6, :]

    # Rows holding real (non-halo) time steps: r % EXT in [EXTPAD, EXTPAD + T).
    r_idx = jax.lax.broadcasted_iota(jnp.int32, (ROWS, CP), 0)
    real = functools.reduce(
        jnp.logical_or,
        [jnp.logical_and(r_idx >= b * EXT + EXTPAD, r_idx < b * EXT + EXTPAD + T)
         for b in range(B)])
    inv_n = 1.0 / float(N_REAL)

    def batchnorm(y, gamma, beta):
        # Biased batch stats over the real rows; (y - mean) computed once and
        # reused for both the variance and the normalization.
        mean = jnp.sum(jnp.where(real, y, 0.0), axis=0, keepdims=True) * inv_n
        d = y - mean
        var = jnp.sum(jnp.where(real, d * d, 0.0), axis=0, keepdims=True) * inv_n
        return d * jax.lax.rsqrt(var + EPS) * gamma + beta

    def conv(src, layer, dil, pad, bias):
        # Time shift by (k*dil - pad) rows via an XLU sublane rotation; the
        # rotation's wraparound only reaches halo rows (zeroed / masked /
        # discarded), so it exactly reproduces zero-padded convolution on the
        # real rows.  One MXU matmul per tap, accumulated in f32.
        acc = None
        for k in range(K):
            shift = k * dil - pad
            win = src if shift == 0 else pltpu.roll(src, (-shift) % ROWS, axis=0)
            part = jnp.dot(win, w_ref[layer * K + k],
                           preferred_element_type=jnp.float32)
            acc = part if acc is None else acc + part
        return acc + bias

    # ---- conv1 -> BN1 -> ReLU; halo rows zeroed so they act as conv2's padding ----
    y1 = conv(x_ref[...], 0, DIL, PAD1, b1)
    h1 = jnp.where(real, jnp.maximum(batchnorm(y1, g1, be1), 0.0), 0.0)

    # ---- conv2 (dilation DIL2) -> BN2 -> residual -> ReLU -------------------------
    y2 = conv(h1, 1, DIL2, PAD2, b2)
    out_ref[...] = jnp.maximum(batchnorm(y2, g2, be2) + x_ref[...], 0.0)


def cnn1d_forward(x_bct, params):
    """x_bct: (B, C, T) float32 -> (B, C, T) float32 (PyTorch NCL layout)."""
    x_btc = jnp.transpose(x_bct, (0, 2, 1)).astype(jnp.float32)           # (B, T, C)
    # Zero-pad channels to CP lanes and time by the halo, then flatten
    # (B, EXT) onto the sublane axis (pure layout plumbing, no compute).
    x_ext = jnp.pad(x_btc, ((0, 0), (EXTPAD, EXTPAD), (0, CP - C)))       # (B, EXT, CP)
    x_flat = x_ext.reshape(ROWS, CP)                                      # (ROWS, CP)

    def tap_w(w_oik, k):  # nn.Conv1d weight (O, I, K), tap k -> (CP, CP) [i, o]
        w = jnp.transpose(w_oik[:, :, k]).astype(jnp.float32)             # (I, O)
        return jnp.pad(w, ((0, CP - C), (0, CP - C)))                     # (CP, CP)

    w_all = jnp.stack([tap_w(params["w1"], k) for k in range(K)]
                      + [tap_w(params["w2"], k) for k in range(K)])       # (2K, CP, CP)

    def vec(p):
        return jnp.pad(p.astype(jnp.float32), (0, CP - C))

    zrow = jnp.zeros((CP,), jnp.float32)
    p_all = jnp.stack([vec(params["b1"]), vec(params["g1"]), vec(params["be1"]),
                       vec(params["b2"]), vec(params["g2"]), vec(params["be2"]),
                       zrow, zrow])                                       # (8, CP)

    vmem = pl.BlockSpec(memory_space=pltpu.MemorySpace.VMEM)
    out_ext = pl.pallas_call(
        _cnn1d_kernel,
        out_shape=jax.ShapeDtypeStruct((ROWS, CP), jnp.float32),
        in_specs=[vmem, vmem, vmem],
        out_specs=vmem,
    )(x_flat, w_all, p_all)
    # TODO(synk): at production sizes, tile B/T with a ("parallel", ...) grid (plus a
    # cross-tile reduction for the BatchNorm statistics) so v7x's second TensorCore
    # is used and per-call overhead is amortized; a single program is right here.

    out = out_ext.reshape(B, EXT, CP)[:, EXTPAD:EXTPAD + T, :C]           # (B, T, C)
    return jnp.transpose(out, (0, 2, 1))                                  # (B, C, T)


def _reference(x, p):
    """Pure-JAX reference mirroring the PyTorch forward (NCL layout)."""
    def conv(y, w, b, pad, dil):
        out = jax.lax.conv_general_dilated(
            y, w, window_strides=(1,), padding=[(pad, pad)],
            rhs_dilation=(dil,), dimension_numbers=("NCH", "OIH", "NCH"))
        return out + b[None, :, None]

    def bn(y, g, b):
        m = jnp.mean(y, axis=(0, 2), keepdims=True)
        v = jnp.mean((y - m) ** 2, axis=(0, 2), keepdims=True)
        return (y - m) / jnp.sqrt(v + EPS) * g[None, :, None] + b[None, :, None]

    y = jax.nn.relu(bn(conv(x, p["w1"], p["b1"], PAD1, DIL), p["g1"], p["be1"]))
    y = bn(conv(y, p["w2"], p["b2"], PAD2, DIL2), p["g2"], p["be2"])
    return jax.nn.relu(y + x)


if __name__ == "__main__":
    key = jax.random.PRNGKey(0)
    kx, k1, k2, k3, k4 = jax.random.split(key, 5)

    x = jax.random.normal(kx, (B, C, T), jnp.float32)
    params = {
        # nn.Conv1d weights (out_channels, in_channels, kernel) and biases
        "w1": jax.random.normal(k1, (C, C, K), jnp.float32) * 0.3,
        "b1": jax.random.normal(k2, (C,), jnp.float32) * 0.1,
        "w2": jax.random.normal(k3, (C, C, K), jnp.float32) * 0.3,
        "b2": jax.random.normal(k4, (C,), jnp.float32) * 0.1,
        # nn.BatchNorm1d default init: weight = 1, bias = 0
        "g1": jnp.ones((C,), jnp.float32), "be1": jnp.zeros((C,), jnp.float32),
        "g2": jnp.ones((C,), jnp.float32), "be2": jnp.zeros((C,), jnp.float32),
    }

    out = jax.jit(lambda xx: cnn1d_forward(xx, params))(x)
    out = jax.block_until_ready(out)

    ref = jax.block_until_ready(_reference(x, params))
    assert out.shape == (B, C, T)
    np.testing.assert_allclose(np.asarray(out), np.asarray(ref),
                               rtol=2e-4, atol=2e-4)
    print("KERNEL_OK")
</pallas_src>

<mosaic_0001>
module attributes {stable_mosaic.version = 11 : i64} {
  func.func @_cnn1d_kernel(%arg0: memref<48x128xf32, #tpu.memory_space<vmem>>, %arg1: memref<6x128x128xf32, #tpu.memory_space<vmem>>, %arg2: memref<8x128xf32, #tpu.memory_space<vmem>>, %arg3: memref<48x128xf32, #tpu.memory_space<vmem>>) attributes {dimension_semantics = [], scalar_prefetch = 0 : i64, scratch_operands = 0 : i64, tpu.core_type = #tpu.core_type<tc>} {
    %c0 = arith.constant 0 : index
    %c0_0 = arith.constant 0 : index
    %0 = vector.load %arg2[%c0, %c0_0] : memref<8x128xf32, #tpu.memory_space<vmem>>, vector<1x128xf32>
    %c1 = arith.constant 1 : index
    %c0_1 = arith.constant 0 : index
    %1 = vector.load %arg2[%c1, %c0_1] : memref<8x128xf32, #tpu.memory_space<vmem>>, vector<1x128xf32>
    %c2 = arith.constant 2 : index
    %c0_2 = arith.constant 0 : index
    %2 = vector.load %arg2[%c2, %c0_2] : memref<8x128xf32, #tpu.memory_space<vmem>>, vector<1x128xf32>
    %c3 = arith.constant 3 : index
    %c0_3 = arith.constant 0 : index
    %3 = vector.load %arg2[%c3, %c0_3] : memref<8x128xf32, #tpu.memory_space<vmem>>, vector<1x128xf32>
    %c4 = arith.constant 4 : index
    %c0_4 = arith.constant 0 : index
    %4 = vector.load %arg2[%c4, %c0_4] : memref<8x128xf32, #tpu.memory_space<vmem>>, vector<1x128xf32>
    %c5 = arith.constant 5 : index
    %c0_5 = arith.constant 0 : index
    %5 = vector.load %arg2[%c5, %c0_5] : memref<8x128xf32, #tpu.memory_space<vmem>>, vector<1x128xf32>
    %6 = tpu.iota {dimensions = array<i32: 0>} : vector<48x128xi32>
    %c4_i32 = arith.constant 4 : i32
    %7 = vector.broadcast %c4_i32 : i32 to vector<48x128xi32>
    %8 = arith.cmpi sge, %6, %7 : vector<48x128xi32>
    %c20_i32 = arith.constant 20 : i32
    %9 = vector.broadcast %c20_i32 : i32 to vector<48x128xi32>
    %10 = arith.cmpi slt, %6, %9 : vector<48x128xi32>
    %11 = arith.andi %8, %10 : vector<48x128xi1>
    %c28_i32 = arith.constant 28 : i32
    %12 = vector.broadcast %c28_i32 : i32 to vector<48x128xi32>
    %13 = arith.cmpi sge, %6, %12 : vector<48x128xi32>
    %c44_i32 = arith.constant 44 : i32
    %14 = vector.broadcast %c44_i32 : i32 to vector<48x128xi32>
    %15 = arith.cmpi slt, %6, %14 : vector<48x128xi32>
    %16 = arith.andi %13, %15 : vector<48x128xi1>
    %17 = arith.ori %11, %16 : vector<48x128xi1>
    %c0_6 = arith.constant 0 : index
    %c0_7 = arith.constant 0 : index
    %18 = vector.load %arg0[%c0_6, %c0_7] : memref<48x128xf32, #tpu.memory_space<vmem>>, vector<48x128xf32>
    %c1_i32 = arith.constant 1 : i32
    %19 = tpu.dynamic_rotate %18 by %c1_i32 dim 0 : vector<48x128xf32>, i32 -> vector<48x128xf32>
    %c0_8 = arith.constant 0 : index
    %c0_9 = arith.constant 0 : index
    %c0_10 = arith.constant 0 : index
    %20 = vector.load %arg1[%c0_8, %c0_9, %c0_10] : memref<6x128x128xf32, #tpu.memory_space<vmem>>, vector<1x128x128xf32>
    %21 = vector.shape_cast %20 : vector<1x128x128xf32> to vector<128x128xf32>
    %cst = arith.constant dense<0.000000e+00> : vector<48x128xf32>
    %22 = tpu.matmul %19, %21, %cst {dimension_numbers = #tpu.dot_dimension_numbers<[1], [0], [0], [1], [0, 0, 1, 1], [], []>} : vector<48x128xf32>, vector<128x128xf32>, vector<48x128xf32> -> vector<48x128xf32>
    %c1_11 = arith.constant 1 : index
    %c0_12 = arith.constant 0 : index
    %c0_13 = arith.constant 0 : index
    %23 = vector.load %arg1[%c1_11, %c0_12, %c0_13] : memref<6x128x128xf32, #tpu.memory_space<vmem>>, vector<1x128x128xf32>
    %24 = vector.shape_cast %23 : vector<1x128x128xf32> to vector<128x128xf32>
    %cst_14 = arith.constant dense<0.000000e+00> : vector<48x128xf32>
    %25 = tpu.matmul %18, %24, %cst_14 {dimension_numbers = #tpu.dot_dimension_numbers<[1], [0], [0], [1], [0, 0, 1, 1], [], []>} : vector<48x128xf32>, vector<128x128xf32>, vector<48x128xf32> -> vector<48x128xf32>
    %26 = arith.addf %22, %25 : vector<48x128xf32>
    %c47_i32 = arith.constant 47 : i32
    %27 = tpu.dynamic_rotate %18 by %c47_i32 dim 0 : vector<48x128xf32>, i32 -> vector<48x128xf32>
    %c2_15 = arith.constant 2 : index
    %c0_16 = arith.constant 0 : index
    %c0_17 = arith.constant 0 : index
    %28 = vector.load %arg1[%c2_15, %c0_16, %c0_17] : memref<6x128x128xf32, #tpu.memory_space<vmem>>, vector<1x128x128xf32>
    %29 = vector.shape_cast %28 : vector<1x128x128xf32> to vector<128x128xf32>
    %cst_18 = arith.constant dense<0.000000e+00> : vector<48x128xf32>
    %30 = tpu.matmul %27, %29, %cst_18 {dimension_numbers = #tpu.dot_dimension_numbers<[1], [0], [0], [1], [0, 0, 1, 1], [], []>} : vector<48x128xf32>, vector<128x128xf32>, vector<48x128xf32> -> vector<48x128xf32>
    %31 = arith.addf %26, %30 : vector<48x128xf32>
    %32 = vector.broadcast %0 : vector<1x128xf32> to vector<48x128xf32>
    %33 = arith.addf %31, %32 : vector<48x128xf32>
    %cst_19 = arith.constant 0.000000e+00 : f32
    %34 = vector.broadcast %cst_19 : f32 to vector<48x128xf32>
    %35 = arith.select %17, %33, %34 : vector<48x128xi1>, vector<48x128xf32>
    %cst_20 = arith.constant dense<0.000000e+00> : vector<128xf32>
    %36 = vector.multi_reduction <add>, %35, %cst_20 [0] : vector<48x128xf32> to vector<128xf32>
    %37 = vector.shape_cast %36 : vector<128xf32> to vector<1x128xf32>
    %cst_21 = arith.constant 3.125000e-02 : f32
    %38 = vector.broadcast %cst_21 : f32 to vector<1x128xf32>
    %39 = arith.mulf %37, %38 : vector<1x128xf32>
    %40 = vector.broadcast %39 : vector<1x128xf32> to vector<48x128xf32>
    %41 = arith.subf %33, %40 : vector<48x128xf32>
    %42 = arith.mulf %41, %41 : vector<48x128xf32>
    %cst_22 = arith.constant 0.000000e+00 : f32
    %43 = vector.broadcast %cst_22 : f32 to vector<48x128xf32>
    %44 = arith.select %17, %42, %43 : vector<48x128xi1>, vector<48x128xf32>
    %cst_23 = arith.constant dense<0.000000e+00> : vector<128xf32>
    %45 = vector.multi_reduction <add>, %44, %cst_23 [0] : vector<48x128xf32> to vector<128xf32>
    %46 = vector.shape_cast %45 : vector<128xf32> to vector<1x128xf32>
    %cst_24 = arith.constant 3.125000e-02 : f32
    %47 = vector.broadcast %cst_24 : f32 to vector<1x128xf32>
    %48 = arith.mulf %46, %47 : vector<1x128xf32>
    %cst_25 = arith.constant 1.000000e-16 : f32
    %49 = vector.broadcast %cst_25 : f32 to vector<1x128xf32>
    %50 = arith.addf %48, %49 : vector<1x128xf32>
    %51 = math.rsqrt %50 : vector<1x128xf32>
    %52 = vector.broadcast %51 : vector<1x128xf32> to vector<48x128xf32>
    %53 = arith.mulf %41, %52 : vector<48x128xf32>
    %54 = vector.broadcast %1 : vector<1x128xf32> to vector<48x128xf32>
    %55 = arith.mulf %53, %54 : vector<48x128xf32>
    %56 = vector.broadcast %2 : vector<1x128xf32> to vector<48x128xf32>
    %57 = arith.addf %55, %56 : vector<48x128xf32>
    %cst_26 = arith.constant 0.000000e+00 : f32
    %58 = vector.broadcast %cst_26 : f32 to vector<48x128xf32>
    %59 = arith.maximumf %57, %58 : vector<48x128xf32>
    %cst_27 = arith.constant 0.000000e+00 : f32
    %60 = vector.broadcast %cst_27 : f32 to vector<48x128xf32>
    %61 = arith.select %17, %59, %60 : vector<48x128xi1>, vector<48x128xf32>
    %c2_i32 = arith.constant 2 : i32
    %62 = tpu.dynamic_rotate %61 by %c2_i32 dim 0 : vector<48x128xf32>, i32 -> vector<48x128xf32>
    %c3_28 = arith.constant 3 : index
    %c0_29 = arith.constant 0 : index
    %c0_30 = arith.constant 0 : index
    %63 = vector.load %arg1[%c3_28, %c0_29, %c0_30] : memref<6x128x128xf32, #tpu.memory_space<vmem>>, vector<1x128x128xf32>
    %64 = vector.shape_cast %63 : vector<1x128x128xf32> to vector<128x128xf32>
    %cst_31 = arith.constant dense<0.000000e+00> : vector<48x128xf32>
    %65 = tpu.matmul %62, %64, %cst_31 {dimension_numbers = #tpu.dot_dimension_numbers<[1], [0], [0], [1], [0, 0, 1, 1], [], []>} : vector<48x128xf32>, vector<128x128xf32>, vector<48x128xf32> -> vector<48x128xf32>
    %c4_32 = arith.constant 4 : index
    %c0_33 = arith.constant 0 : index
    %c0_34 = arith.constant 0 : index
    %66 = vector.load %arg1[%c4_32, %c0_33, %c0_34] : memref<6x128x128xf32, #tpu.memory_space<vmem>>, vector<1x128x128xf32>
    %67 = vector.shape_cast %66 : vector<1x128x128xf32> to vector<128x128xf32>
    %cst_35 = arith.constant dense<0.000000e+00> : vector<48x128xf32>
    %68 = tpu.matmul %61, %67, %cst_35 {dimension_numbers = #tpu.dot_dimension_numbers<[1], [0], [0], [1], [0, 0, 1, 1], [], []>} : vector<48x128xf32>, vector<128x128xf32>, vector<48x128xf32> -> vector<48x128xf32>
    %69 = arith.addf %65, %68 : vector<48x128xf32>
    %c46_i32 = arith.constant 46 : i32
    %70 = tpu.dynamic_rotate %61 by %c46_i32 dim 0 : vector<48x128xf32>, i32 -> vector<48x128xf32>
    %c5_36 = arith.constant 5 : index
    %c0_37 = arith.constant 0 : index
    %c0_38 = arith.constant 0 : index
    %71 = vector.load %arg1[%c5_36, %c0_37, %c0_38] : memref<6x128x128xf32, #tpu.memory_space<vmem>>, vector<1x128x128xf32>
    %72 = vector.shape_cast %71 : vector<1x128x128xf32> to vector<128x128xf32>
    %cst_39 = arith.constant dense<0.000000e+00> : vector<48x128xf32>
    %73 = tpu.matmul %70, %72, %cst_39 {dimension_numbers = #tpu.dot_dimension_numbers<[1], [0], [0], [1], [0, 0, 1, 1], [], []>} : vector<48x128xf32>, vector<128x128xf32>, vector<48x128xf32> -> vector<48x128xf32>
    %74 = arith.addf %69, %73 : vector<48x128xf32>
    %75 = vector.broadcast %3 : vector<1x128xf32> to vector<48x128xf32>
    %76 = arith.addf %74, %75 : vector<48x128xf32>
    %cst_40 = arith.constant 0.000000e+00 : f32
    %77 = vector.broadcast %cst_40 : f32 to vector<48x128xf32>
    %78 = arith.select %17, %76, %77 : vector<48x128xi1>, vector<48x128xf32>
    %cst_41 = arith.constant dense<0.000000e+00> : vector<128xf32>
    %79 = vector.multi_reduction <add>, %78, %cst_41 [0] : vector<48x128xf32> to vector<128xf32>
    %80 = vector.shape_cast %79 : vector<128xf32> to vector<1x128xf32>
    %cst_42 = arith.constant 3.125000e-02 : f32
    %81 = vector.broadcast %cst_42 : f32 to vector<1x128xf32>
    %82 = arith.mulf %80, %81 : vector<1x128xf32>
    %83 = vector.broadcast %82 : vector<1x128xf32> to vector<48x128xf32>
    %84 = arith.subf %76, %83 : vector<48x128xf32>
    %85 = arith.mulf %84, %84 : vector<48x128xf32>
    %cst_43 = arith.constant 0.000000e+00 : f32
    %86 = vector.broadcast %cst_43 : f32 to vector<48x128xf32>
    %87 = arith.select %17, %85, %86 : vector<48x128xi1>, vector<48x128xf32>
    %cst_44 = arith.constant dense<0.000000e+00> : vector<128xf32>
    %88 = vector.multi_reduction <add>, %87, %cst_44 [0] : vector<48x128xf32> to vector<128xf32>
    %89 = vector.shape_cast %88 : vector<128xf32> to vector<1x128xf32>
    %cst_45 = arith.constant 3.125000e-02 : f32
    %90 = vector.broadcast %cst_45 : f32 to vector<1x128xf32>
    %91 = arith.mulf %89, %90 : vector<1x128xf32>
    %cst_46 = arith.constant 1.000000e-16 : f32
    %92 = vector.broadcast %cst_46 : f32 to vector<1x128xf32>
    %93 = arith.addf %91, %92 : vector<1x128xf32>
    %94 = math.rsqrt %93 : vector<1x128xf32>
    %95 = vector.broadcast %94 : vector<1x128xf32> to vector<48x128xf32>
    %96 = arith.mulf %84, %95 : vector<48x128xf32>
    %97 = vector.broadcast %4 : vector<1x128xf32> to vector<48x128xf32>
    %98 = arith.mulf %96, %97 : vector<48x128xf32>
    %99 = vector.broadcast %5 : vector<1x128xf32> to vector<48x128xf32>
    %100 = arith.addf %98, %99 : vector<48x128xf32>
    %c0_47 = arith.constant 0 : index
    %c0_48 = arith.constant 0 : index
    %101 = vector.load %arg0[%c0_47, %c0_48] : memref<48x128xf32, #tpu.memory_space<vmem>>, vector<48x128xf32>
    %102 = arith.addf %100, %101 : vector<48x128xf32>
    %cst_49 = arith.constant 0.000000e+00 : f32
    %103 = vector.broadcast %cst_49 : f32 to vector<48x128xf32>
    %104 = arith.maximumf %102, %103 : vector<48x128xf32>
    %c0_50 = arith.constant 0 : index
    %c0_51 = arith.constant 0 : index
    %105 = vector.load %arg3[%c0_50, %c0_51] : memref<48x128xf32, #tpu.memory_space<vmem>>, vector<48x128xf32>
    tpu.vector_store %arg3[%c0_50, %c0_51], %104 {strides = array<i32>} : memref<48x128xf32, #tpu.memory_space<vmem>>, vector<48x128xf32>,
    return
  }
}

</mosaic_0001>

<bundles_post_ra>
// kernel: _lambda_.1
= control target key start
LH: loop header
LB: loop body
LE: loop exit
PB: predicated region body
PF: predicated region fallthrough
CT: control target
= control target key end

     0   :  { %8 = vsyncpa [#allocation3], 0  ;;  %s1666_s12 = smov [#allocation2]   ;;  %s1935_s0 = inlined_call_operand.vmem [shape: f32[48,128], index: 0, kind: input, shape index: {}]   ;;  %s1936_s1 = inlined_call_operand.hbm [shape: f32[6,128,128], index: 1, kind: input, shape index: {}]   ;;  %s1937_s2 = inlined_call_operand.vmem [shape: f32[8,128], index: 2, kind: input, shape index: {}]   ;;  %s1938_s3 = inlined_call_operand.vmem [shape: f32[48,128], index: 3, kind: output, shape index: {}]  }
   0x1   :  { %s16_s13 = sshll.u32 %s1666_s12, 4  ;;  %s1642_s16 = scalar_lea.hbm %s1936_s1, 12288  ;;  %s17_s13 = int_to_ptr.vmem [resolvable:$true] %s16_s13 }
   0x2   :  { %p1643_p0 = scmp.ne.s32.totalorder %s1936_s1, %s1642_s16  ;;  %p1646_p1 = scmp.lt.u32.totalorder %s1642_s16, %s1936_s1 }
   0x4   :  { %p1648_p2 = pnand %p1646_p1, %p1643_p0 }
   0x6   :  { %1651 = shalt.err (!%p1648_p2)
}
   0x7   :  { %s1652_s21 = scalar_lea.vmem %s17_s13, 12288  ;;  %p1657_p4 = scmp.lt.s32.totalorder %s17_s13, %s17_s13 }
   0x8   :  { %p1653_p3 = scmp.ne.s32.totalorder %s17_s13, %s1652_s21  ;;  %p1658_p5 = scmp.lt.s32.totalorder %s1652_s21, %s1652_s21 }
   0xa   :  { %p1659_p6 = por %p1658_p5, %p1657_p4 }
   0xc   :  { %p1660_p7 = pnand %p1659_p6, %p1653_p3 }
   0xe   :  { %1663 = shalt.err (!%p1660_p7)
}
   0xf   :  { %s1667_s22 = smov 128   ;;  %s1668_s23 = smov 8  }
  0x10   :  { %22 = dma.hbm_to_vmem [thread:$0]  %s1936_s1, 12288, %s17_s13, [#allocation3], %s1667_s22, %s1667_s22, %s1668_s23  }
  0x11   :  { %1664 = dma.done.wait [#allocation3], 12288  }
  0x12   :  { %1665 = vsyncadd [#allocation3], 4294955008  ;;  %v119_v0 = vld [vmem:[#allocation2 + $0x80] sm:$0xff]  ;;  %v120_v1 = vld [vmem:[#allocation2 + $0x88] sm:$0xff]  ;;  %v34_v30 = vlaneseq }
  0x13   :  { %v121_v2 = vld [vmem:[#allocation2 + $0x90] sm:$0xff]  ;;  %v1419_v3 = vpack.c.bf16 %v120_v1, %v119_v0  ;;  %v122_v4 = vld [vmem:[#allocation2 + $0x98] sm:$0xff]  ;;  %v123_v6 = vld [vmem:[#allocation2 + $0xa0] sm:$0xff] }
  0x14   :  { %v1423_v5 = vpack.c.bf16 %v122_v4, %v121_v2  ;;  %v124_v7 = vld [vmem:[#allocation2 + $0xa8] sm:$0xff]  ;;  %v1704_v9 = vld [vmem:[%s1935_s0] sm:$0xff]  ;;  %v125_v10 = vld [vmem:[#allocation2 + $0xb0] sm:$0xff]  ;;  %v1722_v37 = vshrl.u32 %v34_v30, 7 }
  0x15   :  { %1420 = vmatprep.subr.bf16.mxu0 %v1419_v3  ;;  %v1427_v8 = vpack.c.bf16 %v124_v7, %v123_v6  ;;  %v126_v11 = vld [vmem:[#allocation2 + $0xb8] sm:$0xff]  ;;  %1205 = vmatprep.mubr.f32.mxu0 %v1704_v9  ;;  %v127_v13 = vld [vmem:[#allocation2 + $0xc0] sm:$0xff]  ;;  %v128_v14 = vld [vmem:[#allocation2 + $0xc8] sm:$0xff]  ;;  %v89_v41 = vrot.slane %v1704_v9, 7 }
  0x16   :  { %1422 = vmatpush3.bf16.msra.mxu0 %v1419_v3  ;;  %v1431_v12 = vpack.c.bf16 %v126_v11, %v125_v10  ;;  %v1435_v15 = vpack.c.bf16 %v128_v14, %v127_v13  ;;  %v129_v16 = vld [vmem:[#allocation2 + $0xd0] sm:$0xff]  ;;  %v130_v17 = vld [vmem:[#allocation2 + $0xd8] sm:$0xff]  ;;  %v131_v19 = vld [vmem:[#allocation2 + $0xe0] sm:$0xff]  ;;  %vm95_vm0 = vcmp.lt.s32.totalorder %v1722_v37, 1  ;;  %v325_v13 = vrot.slane %v1704_v9, 1 }
  0x17   :  { %1424 = vmatprep.subr.bf16.mxu0 %v1423_v5  ;;  %v1439_v18 = vpack.c.bf16 %v130_v17, %v129_v16  ;;  %v132_v20 = vld [vmem:[#allocation2 + $0xe8] sm:$0xff]  ;;  %v133_v22 = vld [vmem:[#allocation2 + $0xf0] sm:$0xff]  ;;  %v134_v23 = vld [vmem:[#allocation2 + $0xf8] sm:$0xff]  ;;  %vm331_vm1 = vcmp.lt.s32.totalorder %v1722_v37, 7  ;;  %vm41_vm2 = vcmp.ge.s32.totalorder %v1722_v37, 4  ;;  %vm560_vm6 = vcmp.lt.s32.totalorder %v1722_v37, 2 }
  0x18   :  { %v1443_v21 = vpack.c.bf16 %v132_v20, %v131_v19  ;;  %v1447_v24 = vpack.c.bf16 %v134_v23, %v133_v22  ;;  %v102_v25 = vld [vmem:[#allocation2] sm:$0xff]  ;;  %v103_v26 = vld [vmem:[#allocation2 + $0x8] sm:$0xff]  ;;  %v104_v28 = vld [vmem:[#allocation2 + $0x10] sm:$0xff]  ;;  %vm797_vm7 = vcmp.lt.s32.totalorder %v1722_v37, 6 }
  0x19   :  { %v1451_v27 = vpack.c.bf16 %v103_v26, %v102_v25  ;;  %v105_v29 = vld [vmem:[#allocation2 + $0x18] sm:$0xff]  ;;  %v1710_v31 = vld [vmem:[%s1935_s0 + $0x8] sm:$0xff]  ;;  %v1715_v33 = vld [vmem:[%s1935_s0 + $0x10] sm:$0xff] }
  0x1a   :  { %1426 = vmatpush3.bf16.msra.mxu0 %v1423_v5  ;;  %v1455_v32 = vpack.c.bf16 %v105_v29, %v104_v28  ;;  %v106_v34 = vld [vmem:[#allocation2 + $0x20] sm:$0xff]  ;;  %v107_v35 = vld [vmem:[#allocation2 + $0x28] sm:$0xff]  ;;  %v1729_v38 = vld [vmem:[%s1935_s0 + $0x18] sm:$0xff]  ;;  %v90_v61 = vrot.slane %v1710_v31, 7  ;;  %v91_v63 = vrot.slane %v1715_v33, 7  ;;  %v326_v14 = vrot.slane %v1710_v31, 1 }
  0x1b   :  { %1428 = vmatprep.subr.bf16.mxu0 %v1427_v8  ;;  %v1720_v36 = vld [vmem:[%s1935_s0 + $0x28] sm:$0xff]  ;;  %v1459_v39 = vpack.c.bf16 %v107_v35, %v106_v34  ;;  %v1734_v40 = vld [vmem:[%s1935_s0 + $0x20] sm:$0xff]  ;;  %v108_v43 = vld [vmem:[#allocation2 + $0x30] sm:$0xff]  ;;  %v92_v3 = vrot.slane %v1729_v38, 7  ;;  %v327_v34 = vrot.slane %v1715_v33, 1  ;;  %v328_v35 = vrot.slane %v1729_v38, 1 }
  0x1c   :  { %v94_v42 = vrot.slane %v1720_v36, 7  ;;  %v109_v44 = vld [vmem:[#allocation2 + $0x38] sm:$0xff]  ;;  %v110_v47 = vld [vmem:[#allocation2 + $0x40] sm:$0xff]  ;;  %v111_v48 = vld [vmem:[#allocation2 + $0x48] sm:$0xff]  ;;  %v100_v2 = vsel %vm95_vm0, %v89_v41, %v90_v61  ;;  %v99_v5 = vsel %vm95_vm0, %v90_v61, %v91_v63  ;;  %v93_v6 = vrot.slane %v1734_v40, 7 }
  0x1d   :  { %v1463_v45 = vpack.c.bf16 %v109_v44, %v108_v43  ;;  %v1467_v49 = vpack.c.bf16 %v111_v48, %v110_v47  ;;  %v112_v50 = vld [vmem:[#allocation2 + $0x50] sm:$0xff]  ;;  %v113_v51 = vld [vmem:[#allocation2 + $0x58] sm:$0xff]  ;;  %v114_v53 = vld [vmem:[#allocation2 + $0x60] sm:$0xff]  ;;  %v98_v10 = vsel %vm95_vm0, %v91_v63, %v92_v3  ;;  %v336_v19 = vsel %vm331_vm1, %v325_v13, %v326_v14 }
  0x1e   :  { %1430 = vmatpush3.bf16.msra.mxu0 %v1427_v8  ;;  %v101_v46 = vsel %vm95_vm0, %v94_v42, %v89_v41  ;;  %v1471_v52 = vpack.c.bf16 %v113_v51, %v112_v50  ;;  %v115_v54 = vld [vmem:[#allocation2 + $0x68] sm:$0xff]  ;;  %v116_v56 = vld [vmem:[#allocation2 + $0x70] sm:$0xff]  ;;  %v117_v57 = vld [vmem:[#allocation2 + $0x78] sm:$0xff]  ;;  %v96_v17 = vsel %vm95_vm0, %v93_v6, %v94_v42  ;;  %v329_v41 = vrot.slane %v1734_v40, 1 }
  0x1f   :  { %1432 = vmatprep.subr.bf16.mxu0 %v1431_v12  ;;  %v1475_v55 = vpack.c.bf16 %v115_v54, %v114_v53  ;;  %v1479_v58 = vpack.c.bf16 %v117_v57, %v116_v56  ;;  %v339_v59 = vld [vmem:[#allocation2 + $0x100] sm:$0xff]  ;;  %v340_v60 = vld [vmem:[#allocation2 + $0x108] sm:$0xff]  ;;  %v341_v0 = vld [vmem:[#allocation2 + $0x110] sm:$0xff]  ;;  %v334_v42 = vsel %vm331_vm1, %v327_v34, %v328_v35  ;;  %v330_v43 = vrot.slane %v1720_v36, 1 }
  0x20   :  { %v1483_v62 = vpack.c.bf16 %v340_v60, %v339_v59  ;;  %v342_v1 = vld [vmem:[#allocation2 + $0x118] sm:$0xff]  ;;  %v343_v7 = vld [vmem:[#allocation2 + $0x120] sm:$0xff]  ;;  %v344_v8 = vld [vmem:[#allocation2 + $0x128] sm:$0xff]  ;;  %v333_v44 = vsel %vm331_vm1, %v328_v35, %v329_v41 }
  0x21   :  { %v1487_v4 = vpack.c.bf16 %v342_v1, %v341_v0  ;;  %v1491_v11 = vpack.c.bf16 %v344_v8, %v343_v7  ;;  %v346_v16 = vld [vmem:[#allocation2 + $0x138] sm:$0xff]  ;;  %v347_v20 = vld [vmem:[#allocation2 + $0x140] sm:$0xff]  ;;  %v349_v23 = vld [vmem:[#allocation2 + $0x150] sm:$0xff] }
  0x22   :  { %1434 = vmatpush3.bf16.msra.mxu0 %v1431_v12  ;;  %v97_v12 = vsel %vm95_vm0, %v92_v3, %v93_v6  ;;  %v351_v26 = vld [vmem:[#allocation2 + $0x160] sm:$0xff]  ;;  %v353_v29 = vld [vmem:[#allocation2 + $0x170] sm:$0xff]  ;;  %v354_v30 = vld [vmem:[#allocation2 + $0x178] sm:$0xff] }
  0x23   :  { %1436 = vmatprep.subr.bf16.mxu0 %v1435_v15  ;;  %v585_v47 = vld [vmem:[#allocation2 + $0x200] sm:$0xff]  ;;  %v586_v48 = vld [vmem:[#allocation2 + $0x208] sm:$0xff]  ;;  %v587_v50 = vld [vmem:[#allocation2 + $0x210] sm:$0xff] }
  0x24   :  { %v588_v51 = vld [vmem:[#allocation2 + $0x218] sm:$0xff]  ;;  %v589_v53 = vld [vmem:[#allocation2 + $0x220] sm:$0xff]  ;;  %v590_v54 = vld [vmem:[#allocation2 + $0x228] sm:$0xff] }
  0x25   :  { %v591_v56 = vld [vmem:[#allocation2 + $0x230] sm:$0xff]  ;;  %v592_v57 = vld [vmem:[#allocation2 + $0x238] sm:$0xff]  ;;  %v593_v59 = vld [vmem:[#allocation2 + $0x240] sm:$0xff] }
  0x26   :  { %1438 = vmatpush3.bf16.msra.mxu0 %v1435_v15  ;;  %v345_v15 = vld [vmem:[#allocation2 + $0x130] sm:$0xff]  ;;  %v594_v60 = vld [vmem:[#allocation2 + $0x248] sm:$0xff]  ;;  %v596_v63 = vld [vmem:[#allocation2 + $0x258] sm:$0xff] }
  0x27   :  { %1440 = vmatprep.subr.bf16.mxu0 %v1439_v18  ;;  %v1531_v61 = vpack.c.bf16 %v594_v60, %v593_v59  ;;  %v597_v1 = vld [vmem:[#allocation2 + $0x260] sm:$0xff]  ;;  %v569_v8 = vld [vmem:[#allocation2 + $0x188] sm:$0xff] }
  0x28   :  { %v568_v7 = vld [vmem:[#allocation2 + $0x180] sm:$0xff] }
  0x2a   :  { %1442 = vmatpush3.bf16.msra.mxu0 %v1439_v18  ;;  %v1495_v18 = vpack.c.bf16 %v346_v16, %v345_v15 }
  0x2b   :  { %1444 = vmatprep.subr.bf16.mxu0 %v1443_v21 }
  0x2e   :  { %1446 = vmatpush3.bf16.msra.mxu0 %v1443_v21  ;;  %v348_v21 = vld [vmem:[#allocation2 + $0x148] sm:$0xff] }
  0x2f   :  { %1448 = vmatprep.subr.bf16.mxu0 %v1447_v24  ;;  %v1499_v22 = vpack.c.bf16 %v348_v21, %v347_v20 }
  0x32   :  { %1450 = vmatpush3.bf16.msra.mxu0 %v1447_v24  ;;  %v350_v24 = vld [vmem:[#allocation2 + $0x158] sm:$0xff] }
  0x33   :  { %1452 = vmatprep.subr.bf16.mxu0 %v1451_v27  ;;  %v1503_v25 = vpack.c.bf16 %v350_v24, %v349_v23  ;;  %v1799_v24 = vadd.s32 40, %v1722_v37 }
  0x35   :  { %1206 = vmatmul.mubr.f32.vlgmr.msra.gmra.mrb[0].mxu0 %v1710_v31  ;;  %vm70_vm5 = vcmp.lt.s32.totalorder %v1799_v24, 44 }
  0x36   :  { %1454 = vmatpush3.bf16.msra.mxu0 %v1451_v27  ;;  %1208 = vmatprep.mubr.f32.mxu0 %v1715_v33  ;;  %v352_v27 = vld [vmem:[#allocation2 + $0x168] sm:$0xff] }
  0x37   :  { %1456 = vmatprep.subr.bf16.mxu0 %v1455_v32  ;;  %v1507_v28 = vpack.c.bf16 %v352_v27, %v351_v26 }
  0x39   :  { %1209 = vmatmul.mubr.f32.gmra.mrb[2].mxu0 %v1729_v38 }
  0x3a   :  { %1458 = vmatpush3.bf16.msra.mxu0 %v1455_v32  ;;  %1211 = vmatprep.mubr.f32.mxu0 %v1734_v40  ;;  %v1511_v32 = vpack.c.bf16 %v354_v30, %v353_v29 }
  0x3b   :  { %1460 = vmatprep.subr.bf16.mxu0 %v1459_v39 }
  0x3d   :  { %1212 = vmatmul.mubr.f32.gmra.mrb[4].mxu0 %v1720_v36 }
  0x3e   :  { %1462 = vmatpush3.bf16.msra.mxu0 %v1459_v39  ;;  %1246 = vmatprep.mubr.f32.mxu0 %v101_v46  ;;  %v335_v39 = vsel %vm331_vm1, %v326_v14, %v327_v34  ;;  %v337_v46 = vsel %vm331_vm1, %v330_v43, %v325_v13  ;;  %v1789_v14 = vadd.s32 16, %v1722_v37 }
  0x3f   :  { %1464 = vmatprep.subr.bf16.mxu0 %v1463_v45 }
  0x40   :  { %vm49_vm3 = vcmp.lt.s32.totalorder %v1789_v14, 20 }
  0x42   :  { %1466 = vmatpush3.bf16.msra.mxu0 %v1463_v45  ;;  %v332_v45 = vsel %vm331_vm1, %v329_v41, %v330_v43 }
  0x43   :  { %1468 = vmatprep.subr.bf16.mxu0 %v1467_v49 }
  0x46   :  { %1470 = vmatpush3.bf16.msra.mxu0 %v1467_v49  ;;  %v1515_v49 = vpack.c.bf16 %v586_v48, %v585_v47 }
  0x47   :  { %1472 = vmatprep.subr.bf16.mxu0 %v1471_v52 }
  0x48   :  { %1516 = vmatprep.subr.bf16.mxu1 %v1515_v49 }
  0x49   :  { %1518 = vmatpush3.bf16.msra.mxu1 %v1515_v49 }
  0x4a   :  { %1474 = vmatpush3.bf16.msra.mxu0 %v1471_v52  ;;  %v1519_v52 = vpack.c.bf16 %v588_v51, %v587_v50 }
  0x4b   :  { %1476 = vmatprep.subr.bf16.mxu0 %v1475_v55 }
  0x4c   :  { %1520 = vmatprep.subr.bf16.mxu1 %v1519_v52 }
  0x4d   :  { %1522 = vmatpush3.bf16.msra.mxu1 %v1519_v52 }
  0x4e   :  { %1478 = vmatpush3.bf16.msra.mxu0 %v1475_v55  ;;  %v1523_v55 = vpack.c.bf16 %v590_v54, %v589_v53 }
  0x4f   :  { %1480 = vmatprep.subr.bf16.mxu0 %v1479_v58 }
  0x50   :  { %1524 = vmatprep.subr.bf16.mxu1 %v1523_v55 }
  0x51   :  { %1526 = vmatpush3.bf16.msra.mxu1 %v1523_v55 }
  0x52   :  { %1482 = vmatpush3.bf16.msra.mxu0 %v1479_v58  ;;  %v1527_v58 = vpack.c.bf16 %v592_v57, %v591_v56 }
  0x53   :  { %1484 = vmatprep.subr.bf16.mxu0 %v1483_v62 }
  0x54   :  { %1528 = vmatprep.subr.bf16.mxu1 %v1527_v58 }
  0x55   :  { %1247 = vmatmul.mubr.f32.vlgmr.msra.gmra.mrb[0].mxu0 %v100_v2  ;;  %1530 = vmatpush3.bf16.msra.mxu1 %v1527_v58  ;;  %v598_v2 = vld [vmem:[#allocation2 + $0x268] sm:$0xff] }
  0x56   :  { %1486 = vmatpush3.bf16.msra.mxu0 %v1483_v62  ;;  %1249 = vmatprep.mubr.f32.mxu0 %v99_v5  ;;  %v595_v62 = vld [vmem:[#allocation2 + $0x250] sm:$0xff]  ;;  %v1539_v3 = vpack.c.bf16 %v598_v2, %v597_v1  ;;  %v600_v5 = vld [vmem:[#allocation2 + $0x278] sm:$0xff] }
  0x57   :  { %1488 = vmatprep.subr.bf16.mxu0 %v1487_v4  ;;  %1532 = vmatprep.subr.bf16.mxu1 %v1531_v61  ;;  %v1535_v0 = vpack.c.bf16 %v596_v63, %v595_v62 }
  0x59   :  { %1250 = vmatmul.mubr.f32.gmra.mrb[2].mxu0 %v98_v10  ;;  %1534 = vmatpush3.bf16.msra.mxu1 %v1531_v61  ;;  %v1781_v10 = vpack.c.bf16 %v569_v8, %v568_v7 }
  0x5a   :  { %1490 = vmatpush3.bf16.msra.mxu0 %v1487_v4  ;;  %1252 = vmatprep.mubr.f32.mxu0 %v97_v12  ;;  %v599_v4 = vld [vmem:[#allocation2 + $0x270] sm:$0xff] }
  0x5b   :  { %1492 = vmatprep.subr.bf16.mxu0 %v1491_v11  ;;  %1536 = vmatprep.subr.bf16.mxu1 %v1535_v0  ;;  %v1543_v6 = vpack.c.bf16 %v600_v5, %v599_v4 }
  0x5d   :  { %1253 = vmatmul.mubr.f32.gmra.mrb[4].mxu0 %v96_v17  ;;  %1538 = vmatpush3.bf16.msra.mxu1 %v1535_v0  ;;  %v1792_v17 = vadd.s32 24, %v1722_v37 }
  0x5e   :  { %1494 = vmatpush3.bf16.msra.mxu0 %v1491_v11  ;;  %1287 = vmatprep.mubr.f32.mxu0 %v336_v19  ;;  %v1031_v11 = vld [vmem:[%s1937_s2] ss:$0 sm:$0xff] }
  0x5f   :  { %1496 = vmatprep.subr.bf16.mxu0 %v1495_v18  ;;  %1540 = vmatprep.subr.bf16.mxu1 %v1539_v3  ;;  %vm62_vm4 = vcmp.ge.s32.totalorder %v1792_v17, 28  ;;  %v1039_v17 = vld [vmem:[%s1937_s2 + $0x4] ss:$0 sm:$0xff] }
  0x61   :  { %1542 = vmatpush3.bf16.msra.mxu1 %v1539_v3 }
  0x62   :  { %1498 = vmatpush3.bf16.msra.mxu0 %v1495_v18  ;;  %1544 = vmatprep.subr.bf16.mxu1 %v1543_v6 }
  0x63   :  { %1500 = vmatprep.subr.bf16.mxu0 %v1499_v22 }
  0x65   :  { %1546 = vmatpush3.bf16.msra.mxu1 %v1543_v6 }
  0x66   :  { %1502 = vmatpush3.bf16.msra.mxu0 %v1499_v22  ;;  %1548 = vmatprep.subr.bf16.mxu1 %v1781_v10 }
  0x67   :  { %1504 = vmatprep.subr.bf16.mxu0 %v1503_v25 }
  0x6a   :  { %1506 = vmatpush3.bf16.msra.mxu0 %v1503_v25 }
  0x6b   :  { %1508 = vmatprep.subr.bf16.mxu0 %v1507_v28 }
  0x6e   :  { %1510 = vmatpush3.bf16.msra.mxu0 %v1507_v28 }
  0x6f   :  { %1512 = vmatprep.subr.bf16.mxu0 %v1511_v32 }
  0x72   :  { %1514 = vmatpush3.bf16.msra.mxu0 %v1511_v32 }
  0x75   :  { %1288 = vmatmul.mubr.f32.vlgmr.msra.gmra.mrb[0].mxu0 %v335_v39 }
  0x76   :  { %1290 = vmatprep.mubr.f32.mxu0 %v334_v42 }
  0x79   :  { %1291 = vmatmul.mubr.f32.gmra.mrb[2].mxu0 %v333_v44 }
  0x7a   :  { %1293 = vmatprep.mubr.f32.mxu0 %v332_v45 }
  0x7d   :  { %1294 = vmatmul.mubr.f32.gmra.mrb[4].mxu0 %v337_v46 }
 0x148   :  { %v1289_v12 = vpop.f32.mrb[0].mxu0 }
 0x149   :  { %v421_v13 = vpop.f32.mrb[1].mxu0  ;;  %v461_v16 = vadd.f32 %v1289_v12, %v1031_v11 }
 0x14a   :  { %v460_v15 = vadd.f32 %v1031_v11, %v421_v13 }
 0x14c   :  { %v466_v18 = vsel %vm41_vm2, %v460_v15, 0.0  ;;  %v1292_v19 = vpop.f32.mrb[2].mxu0 }
 0x14d   :  { %v472_v20 = vadd.f32 %v466_v18, %v461_v16  ;;  %v431_v21 = vpop.f32.mrb[3].mxu0  ;;  %v463_v22 = vadd.f32 %v1292_v19, %v1031_v11  ;;  %v1032_v19 = vld [vmem:[%s1937_s2 + $0x1] ss:$0 sm:$0xff] }
 0x14e   :  { %v462_v23 = vadd.f32 %v1031_v11, %v431_v21 }
 0x14f   :  { %v469_v29 = vsel %vm62_vm4, %v463_v22, 0.0 }
 0x150   :  { %v468_v25 = vsel %vm49_vm3, %v462_v23, 0.0  ;;  %v1295_v26 = vpop.f32.mrb[4].mxu0 }
 0x151   :  { %v473_v27 = vadd.f32 %v472_v20, %v468_v25  ;;  %v441_v28 = vpop.f32.mrb[5].mxu0  ;;  %v465_v30 = vadd.f32 %v1295_v26, %v1031_v11  ;;  %v1033_v25 = vld [vmem:[%s1937_s2 + $0x2] ss:$0 sm:$0xff] }
 0x152   :  { %v464_v32 = vadd.f32 %v1031_v11, %v441_v28 }
 0x153   :  { %v474_v34 = vadd.f32 %v473_v27, %v469_v29  ;;  %v471_v39 = vsel %vm70_vm5, %v465_v30, 0.0 }
 0x155   :  { %v475_v35 = vadd.f32 %v474_v34, %v464_v32  ;;  %v571_v34 = vld [vmem:[#allocation2 + $0x198] sm:$0xff] }
 0x157   :  { %v476_v41 = vadd.f32 %v475_v35, %v471_v39 }
 0x159   :  { %v477_v42 = vrot.slane %v476_v41, 4 }
 0x15b   :  { %v478_v43 = vadd.f32 %v477_v42, %v476_v41 }
 0x15d   :  { %v479_v44 = vrot.slane %v478_v43, 2 }
 0x15f   :  { %v480_v45 = vadd.f32 %v479_v44, %v478_v43 }
 0x161   :  { %v481_v46 = vrot.slane %v480_v45, 1 }
 0x163   :  { %v482_v47 = vadd.f32 %v481_v46, %v480_v45  ;;  %v572_v46 = vld [vmem:[#allocation2 + $0x1a0] sm:$0xff] }
 0x165   :  { %v483_v48 = vmul.f32 0.03125, %v482_v47  ;;  %v573_v47 = vld [vmem:[#allocation2 + $0x1a8] sm:$0xff] }
 0x167   :  { %v484_v49 = vsub.f32 %v460_v15, %v483_v48  ;;  %v485_v50 = vsub.f32 %v461_v16, %v483_v48  ;;  %v486_v51 = vsub.f32 %v462_v23, %v483_v48  ;;  %v487_v52 = vsub.f32 %v463_v22, %v483_v48 }
 0x168   :  { %v488_v53 = vsub.f32 %v464_v32, %v483_v48  ;;  %v489_v54 = vsub.f32 %v465_v30, %v483_v48  ;;  %v570_v32 = vld [vmem:[#allocation2 + $0x190] sm:$0xff] }
 0x169   :  { %v490_v55 = vmul.f32 %v484_v49, %v484_v49  ;;  %v491_v56 = vmul.f32 %v485_v50, %v485_v50  ;;  %v492_v57 = vmul.f32 %v486_v51, %v486_v51  ;;  %v493_v58 = vmul.f32 %v487_v52, %v487_v52 }
 0x16a   :  { %v495_v63 = vmul.f32 %v489_v54, %v489_v54  ;;  %v494_v1 = vmul.f32 %v488_v53, %v488_v53  ;;  %v1551_v48 = vpack.c.bf16 %v571_v34, %v570_v32  ;;  %v578_v34 = vld [vmem:[#allocation2 + $0x1d0] sm:$0xff] }
 0x16b   :  { %v496_v59 = vsel %vm41_vm2, %v490_v55, 0.0  ;;  %v498_v61 = vsel %vm49_vm3, %v492_v57, 0.0  ;;  %v499_v0 = vsel %vm62_vm4, %v493_v58, 0.0 }
 0x16c   :  { %v502_v60 = vadd.f32 %v496_v59, %v491_v56  ;;  %v501_v4 = vsel %vm70_vm5, %v495_v63, 0.0  ;;  %v1555_v56 = vpack.c.bf16 %v573_v47, %v572_v46  ;;  %v805_v47 = vld [vmem:[#allocation2 + $0x280] sm:$0xff] }
 0x16e   :  { %v503_v62 = vadd.f32 %v502_v60, %v498_v61 }
 0x170   :  { %v504_v2 = vadd.f32 %v503_v62, %v499_v0 }
 0x172   :  { %v505_v3 = vadd.f32 %v504_v2, %v494_v1 }
 0x174   :  { %v506_v5 = vadd.f32 %v505_v3, %v501_v4 }
 0x176   :  { %v507_v6 = vrot.slane %v506_v5, 4 }
 0x178   :  { %v508_v7 = vadd.f32 %v507_v6, %v506_v5 }
 0x17a   :  { %v509_v8 = vrot.slane %v508_v7, 2 }
 0x17c   :  { %v510_v11 = vadd.f32 %v509_v8, %v508_v7 }
 0x17e   :  { %v511_v12 = vrot.slane %v510_v11, 1 }
 0x180   :  { %v512_v13 = vadd.f32 %v511_v12, %v510_v11  ;;  %v574_v12 = vld [vmem:[#allocation2 + $0x1b0] sm:$0xff] }
 0x182   :  { %v513_v15 = vmul.f32 0.03125, %v512_v13  ;;  %v575_v13 = vld [vmem:[#allocation2 + $0x1b8] sm:$0xff] }
 0x184   :  { %v514_v16 = vadd.f32 1e-16, %v513_v15 }
 0x186   :  { %1638 = vrsqrt.f32 %v514_v16 }
 0x190   :  { %v1639_v18 = vpop.eup %1638 }
 0x191   :  { %v520_v20 = vmul.f32 %v1639_v18, %v488_v53  ;;  %v516_v21 = vmul.f32 %v1639_v18, %v484_v49  ;;  %v517_v22 = vmul.f32 %v1639_v18, %v485_v50  ;;  %v518_v23 = vmul.f32 %v1639_v18, %v486_v51 }
 0x192   :  { %v519_v26 = vmul.f32 %v1639_v18, %v487_v52  ;;  %v521_v27 = vmul.f32 %v1639_v18, %v489_v54 }
 0x193   :  { %v526_v28 = vmul.f32 %v1032_v19, %v516_v21  ;;  %v527_v29 = vmul.f32 %v1032_v19, %v517_v22  ;;  %v528_v30 = vmul.f32 %v1032_v19, %v518_v23  ;;  %v530_v35 = vmul.f32 %v1032_v19, %v520_v20 }
 0x194   :  { %v529_v39 = vmul.f32 %v1032_v19, %v519_v26  ;;  %v531_v41 = vmul.f32 %v1032_v19, %v521_v27  ;;  %v576_v27 = vld [vmem:[#allocation2 + $0x1c0] sm:$0xff] }
 0x195   :  { %v536_v42 = vadd.f32 %v1033_v25, %v526_v28  ;;  %v537_v43 = vadd.f32 %v1033_v25, %v527_v29  ;;  %v538_v44 = vadd.f32 %v1033_v25, %v528_v30  ;;  %v540_v45 = vadd.f32 %v1033_v25, %v530_v35  ;;  %v577_v28 = vld [vmem:[#allocation2 + $0x1c8] sm:$0xff]  ;;  %v579_v35 = vld [vmem:[#allocation2 + $0x1d8] sm:$0xff] }
 0x196   :  { %v539_v49 = vadd.f32 %v1033_v25, %v529_v39  ;;  %v541_v50 = vadd.f32 %v1033_v25, %v531_v41  ;;  %v1559_v25 = vpack.c.bf16 %v575_v13, %v574_v12  ;;  %v1563_v32 = vpack.c.bf16 %v577_v28, %v576_v27  ;;  %v580_v41 = vld [vmem:[#allocation2 + $0x1e0] sm:$0xff] }
 0x197   :  { %v542_v51 = vmax.f32 %v536_v42, 0.0  ;;  %v543_v52 = vmax.f32 %v537_v43, 0.0  ;;  %v544_v53 = vmax.f32 %v538_v44, 0.0  ;;  %v546_v54 = vmax.f32 %v540_v45, 0.0  ;;  %v581_v42 = vld [vmem:[#allocation2 + $0x1e8] sm:$0xff]  ;;  %v582_v44 = vld [vmem:[#allocation2 + $0x1f0] sm:$0xff] }
 0x198   :  { %v545_v55 = vmax.f32 %v539_v49, 0.0  ;;  %v547_v57 = vmax.f32 %v541_v50, 0.0  ;;  %v1567_v39 = vpack.c.bf16 %v579_v35, %v578_v34  ;;  %v1571_v43 = vpack.c.bf16 %v581_v42, %v580_v41  ;;  %v583_v45 = vld [vmem:[#allocation2 + $0x1f8] sm:$0xff]  ;;  %v807_v50 = vld [vmem:[#allocation2 + $0x290] sm:$0xff] }
 0x199   :  { %v548_v58 = vsel %vm41_vm2, %v542_v51, 0.0  ;;  %1328 = vmatprep.mubr.msk.f32.mxu1 %vm41_vm2, %v542_v51  ;;  %v555_v59 = vrot.slane %v543_v52, 6  ;;  %v550_v60 = vsel %vm49_vm3, %v544_v53, 0.0  ;;  %v558_v61 = vrot.slane %v546_v54, 6  ;;  %v808_v51 = vld [vmem:[#allocation2 + $0x298] sm:$0xff] }
 0x19a   :  { %v554_v62 = vrot.slane %v548_v58, 6  ;;  %v791_v63 = vrot.slane %v548_v58, 2  ;;  %1329 = vmatmul.mubr.f32.vlgmr.msra.gmra.mrb[0].mxu1 %v543_v52  ;;  %v553_v0 = vsel %vm70_vm5, %v547_v57, 0.0  ;;  %v556_v1 = vrot.slane %v550_v60, 6 }
 0x19b   :  { %1550 = vmatpush3.bf16.msra.mxu1 %v1781_v10  ;;  %1331 = vmatprep.mubr.msk.f32.mxu1 %vm49_vm3, %v544_v53  ;;  %v559_v2 = vrot.slane %v553_v0, 6  ;;  %v793_v3 = vrot.slane %v550_v60, 2  ;;  %v551_v4 = vsel %vm62_vm4, %v545_v55, 0.0  ;;  %v792_v5 = vrot.slane %v543_v52, 2  ;;  %v809_v53 = vld [vmem:[#allocation2 + $0x2a0] sm:$0xff]  ;;  %v814_v60 = vld [vmem:[#allocation2 + $0x2c8] sm:$0xff] }
 0x19c   :  { %1552 = vmatprep.subr.bf16.mxu1 %v1551_v48  ;;  %v565_v6 = vsel %vm560_vm6, %v554_v62, %v555_v59  ;;  %v564_v7 = vsel %vm560_vm6, %v555_v59, %v556_v1  ;;  %v557_v8 = vrot.slane %v551_v4, 6  ;;  %v794_v11 = vrot.slane %v551_v4, 2  ;;  %v813_v59 = vld [vmem:[#allocation2 + $0x2c0] sm:$0xff]  ;;  %v819_v4 = vld [vmem:[#allocation2 + $0x2f0] sm:$0xff] }
 0x19d   :  { %v566_v10 = vsel %vm560_vm6, %v559_v2, %v554_v62  ;;  %v1845_v15 = vsel %vm560_vm6, %v558_v61, %v559_v2  ;;  %v1849_v16 = vsel %vm797_vm7, %v791_v63, %v792_v5  ;;  %v1853_v18 = vsel %vm797_vm7, %v792_v5, %v793_v3  ;;  %v815_v62 = vld [vmem:[#allocation2 + $0x2d0] sm:$0xff]  ;;  %v818_v2 = vld [vmem:[#allocation2 + $0x2e8] sm:$0xff]  ;;  %v820_v5 = vld [vmem:[#allocation2 + $0x2f8] sm:$0xff] }
 0x19e   :  { %1332 = vmatmul.mubr.msk.f32.gmra.mrb[2].mxu1 %vm62_vm4, %v545_v55  ;;  %v563_v19 = vsel %vm560_vm6, %v556_v1, %v557_v8  ;;  %v562_v20 = vsel %vm560_vm6, %v557_v8, %v558_v61  ;;  %v1863_v21 = vsel %vm797_vm7, %v793_v3, %v794_v11  ;;  %v795_v22 = vrot.slane %v546_v54, 2  ;;  %v817_v1 = vld [vmem:[#allocation2 + $0x2e0] sm:$0xff] }
 0x19f   :  { %1554 = vmatpush3.bf16.msra.mxu1 %v1551_v48  ;;  %1334 = vmatprep.mubr.f32.mxu1 %v546_v54  ;;  %v796_v23 = vrot.slane %v553_v0, 2  ;;  %v1575_v46 = vpack.c.bf16 %v583_v45, %v582_v44  ;;  %v806_v48 = vld [vmem:[#allocation2 + $0x288] sm:$0xff]  ;;  %v1583_v52 = vpack.c.bf16 %v808_v51, %v807_v50  ;;  %v1595_v61 = vpack.c.bf16 %v814_v60, %v813_v59 }
 0x1a0   :  { %1556 = vmatprep.subr.bf16.mxu1 %v1555_v56  ;;  %v1867_v26 = vsel %vm797_vm7, %v794_v11, %v795_v22  ;;  %v1579_v49 = vpack.c.bf16 %v806_v48, %v805_v47  ;;  %v810_v54 = vld [vmem:[#allocation2 + $0x2a8] sm:$0xff]  ;;  %v1603_v3 = vpack.c.bf16 %v818_v2, %v817_v1 }
 0x1a1   :  { %v1871_v29 = vsel %vm797_vm7, %v795_v22, %v796_v23  ;;  %v1875_v30 = vsel %vm797_vm7, %v796_v23, %v791_v63  ;;  %v1587_v55 = vpack.c.bf16 %v810_v54, %v809_v53  ;;  %v816_v63 = vld [vmem:[#allocation2 + $0x2d8] sm:$0xff] }
 0x1a2   :  { %1335 = vmatmul.mubr.msk.f32.gmra.mrb[4].mxu1 %vm70_vm5, %v547_v57  ;;  %v812_v57 = vld [vmem:[#allocation2 + $0x2b8] sm:$0xff]  ;;  %v1599_v0 = vpack.c.bf16 %v816_v63, %v815_v62 }
 0x1a3   :  { %1558 = vmatpush3.bf16.msra.mxu1 %v1555_v56  ;;  %1369 = vmatprep.mubr.f32.mxu1 %v566_v10  ;;  %v811_v56 = vld [vmem:[#allocation2 + $0x2b0] sm:$0xff] }
 0x1a4   :  { %1560 = vmatprep.subr.bf16.mxu1 %v1559_v25  ;;  %v1591_v58 = vpack.c.bf16 %v812_v57, %v811_v56 }
 0x1a7   :  { %1562 = vmatpush3.bf16.msra.mxu1 %v1559_v25 }
 0x1a8   :  { %1564 = vmatprep.subr.bf16.mxu1 %v1563_v32 }
 0x1ab   :  { %1566 = vmatpush3.bf16.msra.mxu1 %v1563_v32 }
 0x1ac   :  { %1568 = vmatprep.subr.bf16.mxu1 %v1567_v39 }
 0x1af   :  { %1570 = vmatpush3.bf16.msra.mxu1 %v1567_v39 }
 0x1b0   :  { %1572 = vmatprep.subr.bf16.mxu1 %v1571_v43 }
 0x1b3   :  { %1574 = vmatpush3.bf16.msra.mxu1 %v1571_v43 }
 0x1b4   :  { %1576 = vmatprep.subr.bf16.mxu1 %v1575_v46 }
 0x1b7   :  { %1578 = vmatpush3.bf16.msra.mxu1 %v1575_v46 }
 0x1b8   :  { %1580 = vmatprep.subr.bf16.mxu1 %v1579_v49 }
 0x1ba   :  { %1370 = vmatmul.mubr.f32.vlgmr.msra.gmra.mrb[0].mxu1 %v565_v6  ;;  %v1607_v6 = vpack.c.bf16 %v820_v5, %v819_v4 }
 0x1bb   :  { %1372 = vmatprep.mubr.f32.mxu1 %v564_v7  ;;  %1582 = vmatpush3.bf16.msra.mxu1 %v1579_v49  ;;  %v1038_v7 = vld [vmem:[%s1937_s2 + $0x3] ss:$0 sm:$0xff] }
 0x1bc   :  { %1584 = vmatprep.subr.bf16.mxu1 %v1583_v52 }
 0x1be   :  { %1373 = vmatmul.mubr.f32.gmra.mrb[2].mxu1 %v563_v19 }
 0x1bf   :  { %1375 = vmatprep.mubr.f32.mxu1 %v562_v20  ;;  %1586 = vmatpush3.bf16.msra.mxu1 %v1583_v52 }
 0x1c0   :  { %1588 = vmatprep.subr.bf16.mxu1 %v1587_v55 }
 0x1c2   :  { %1376 = vmatmul.mubr.f32.gmra.mrb[4].mxu1 %v1845_v15 }
 0x1c3   :  { %1590 = vmatpush3.bf16.msra.mxu1 %v1587_v55  ;;  %1410 = vmatprep.mubr.f32.mxu1 %v1849_v16 }
 0x1c4   :  { %1592 = vmatprep.subr.bf16.mxu1 %v1591_v58 }
 0x1c7   :  { %1594 = vmatpush3.bf16.msra.mxu1 %v1591_v58 }
 0x1c8   :  { %1596 = vmatprep.subr.bf16.mxu1 %v1595_v61 }
 0x1cb   :  { %1598 = vmatpush3.bf16.msra.mxu1 %v1595_v61 }
 0x1cc   :  { %1600 = vmatprep.subr.bf16.mxu1 %v1599_v0 }
 0x1cf   :  { %1602 = vmatpush3.bf16.msra.mxu1 %v1599_v0 }
 0x1d0   :  { %1604 = vmatprep.subr.bf16.mxu1 %v1603_v3 }
 0x1d3   :  { %1606 = vmatpush3.bf16.msra.mxu1 %v1603_v3 }
 0x1d4   :  { %1608 = vmatprep.subr.bf16.mxu1 %v1607_v6 }
 0x1d7   :  { %1610 = vmatpush3.bf16.msra.mxu1 %v1607_v6 }
 0x1da   :  { %1411 = vmatmul.mubr.f32.vlgmr.msra.gmra.mrb[0].mxu1 %v1853_v18 }
 0x1db   :  { %1413 = vmatprep.mubr.f32.mxu1 %v1863_v21 }
 0x1de   :  { %1414 = vmatmul.mubr.f32.gmra.mrb[2].mxu1 %v1867_v26 }
 0x1df   :  { %1416 = vmatprep.mubr.f32.mxu1 %v1871_v29 }
 0x1e2   :  { %1417 = vmatmul.mubr.f32.gmra.mrb[4].mxu1 %v1875_v30 }
 0x2ad   :  { %v1412_v8 = vpop.f32.mrb[0].mxu1 }
 0x2ae   :  { %v887_v11 = vpop.f32.mrb[1].mxu1  ;;  %v927_v12 = vadd.f32 %v1412_v8, %v1038_v7 }
 0x2af   :  { %v926_v10 = vadd.f32 %v1038_v7, %v887_v11 }
 0x2b1   :  { %v932_v13 = vsel %vm41_vm2, %v926_v10, 0.0  ;;  %v1415_v15 = vpop.f32.mrb[2].mxu1 }
 0x2b2   :  { %v938_v16 = vadd.f32 %v932_v13, %v927_v12  ;;  %v897_v18 = vpop.f32.mrb[3].mxu1  ;;  %v929_v19 = vadd.f32 %v1415_v15, %v1038_v7  ;;  %v1040_v15 = vld [vmem:[%s1937_s2 + $0x5] ss:$0 sm:$0xff] }
 0x2b3   :  { %v928_v20 = vadd.f32 %v1038_v7, %v897_v18 }
 0x2b4   :  { %v935_v26 = vsel %vm62_vm4, %v929_v19, 0.0 }
 0x2b5   :  { %v934_v21 = vsel %vm49_vm3, %v928_v20, 0.0  ;;  %v1418_v22 = vpop.f32.mrb[4].mxu1 }
 0x2b6   :  { %v939_v23 = vadd.f32 %v938_v16, %v934_v21  ;;  %v907_v25 = vpop.f32.mrb[5].mxu1  ;;  %v931_v27 = vadd.f32 %v1418_v22, %v1038_v7 }
 0x2b7   :  { %v930_v28 = vadd.f32 %v1038_v7, %v907_v25 }
 0x2b8   :  { %v940_v29 = vadd.f32 %v939_v23, %v935_v26  ;;  %v937_v32 = vsel %vm70_vm5, %v931_v27, 0.0 }
 0x2ba   :  { %v941_v30 = vadd.f32 %v940_v29, %v930_v28 }
 0x2bc   :  { %v942_v34 = vadd.f32 %v941_v30, %v937_v32 }
 0x2be   :  { %v943_v35 = vrot.slane %v942_v34, 4 }
 0x2c0   :  { %v944_v39 = vadd.f32 %v943_v35, %v942_v34 }
 0x2c2   :  { %v945_v41 = vrot.slane %v944_v39, 2 }
 0x2c4   :  { %v946_v42 = vadd.f32 %v945_v41, %v944_v39 }
 0x2c6   :  { %v947_v43 = vrot.slane %v946_v42, 1 }
 0x2c8   :  { %v948_v44 = vadd.f32 %v947_v43, %v946_v42 }
 0x2ca   :  { %v949_v45 = vmul.f32 0.03125, %v948_v44 }
 0x2cc   :  { %v950_v46 = vsub.f32 %v926_v10, %v949_v45  ;;  %v951_v47 = vsub.f32 %v927_v12, %v949_v45  ;;  %v952_v48 = vsub.f32 %v928_v20, %v949_v45  ;;  %v953_v49 = vsub.f32 %v929_v19, %v949_v45 }
 0x2cd   :  { %v954_v50 = vsub.f32 %v930_v28, %v949_v45  ;;  %v955_v51 = vsub.f32 %v931_v27, %v949_v45 }
 0x2ce   :  { %v956_v52 = vmul.f32 %v950_v46, %v950_v46  ;;  %v957_v53 = vmul.f32 %v951_v47, %v951_v47  ;;  %v958_v54 = vmul.f32 %v952_v48, %v952_v48  ;;  %v959_v55 = vmul.f32 %v953_v49, %v953_v49 }
 0x2cf   :  { %v961_v60 = vmul.f32 %v955_v51, %v955_v51  ;;  %v960_v62 = vmul.f32 %v954_v50, %v954_v50 }
 0x2d0   :  { %v962_v56 = vsel %vm41_vm2, %v956_v52, 0.0  ;;  %v964_v58 = vsel %vm49_vm3, %v958_v54, 0.0  ;;  %v965_v61 = vsel %vm62_vm4, %v959_v55, 0.0 }
 0x2d1   :  { %v968_v57 = vadd.f32 %v962_v56, %v957_v53  ;;  %v967_v1 = vsel %vm70_vm5, %v961_v60, 0.0 }
 0x2d3   :  { %v969_v59 = vadd.f32 %v968_v57, %v964_v58 }
 0x2d5   :  { %v970_v63 = vadd.f32 %v969_v59, %v965_v61 }
 0x2d7   :  { %v971_v0 = vadd.f32 %v970_v63, %v960_v62 }
 0x2d9   :  { %v972_v2 = vadd.f32 %v971_v0, %v967_v1 }
 0x2db   :  { %v973_v3 = vrot.slane %v972_v2, 4 }
 0x2dd   :  { %v974_v4 = vadd.f32 %v973_v3, %v972_v2 }
 0x2df   :  { %v975_v37 = vrot.slane %v974_v4, 2 }
 0x2e1   :  { %v976_v5 = vadd.f32 %v975_v37, %v974_v4 }
 0x2e3   :  { %v977_v6 = vrot.slane %v976_v5, 1 }
 0x2e5   :  { %v978_v7 = vadd.f32 %v977_v6, %v976_v5 }
 0x2e7   :  { %v979_v14 = vmul.f32 0.03125, %v978_v7 }
 0x2e9   :  { %v980_v8 = vadd.f32 1e-16, %v979_v14 }
 0x2eb   :  { %1640 = vrsqrt.f32 %v980_v8 }
 0x2f5   :  { %v1641_v11 = vpop.eup %1640 }
 0x2f6   :  { %v982_v10 = vmul.f32 %v1641_v11, %v950_v46  ;;  %v983_v12 = vmul.f32 %v1641_v11, %v951_v47  ;;  %v984_v13 = vmul.f32 %v1641_v11, %v952_v48  ;;  %v985_v24 = vmul.f32 %v1641_v11, %v953_v49 }
 0x2f7   :  { %v986_v16 = vmul.f32 %v1641_v11, %v954_v50  ;;  %v987_v18 = vmul.f32 %v1641_v11, %v955_v51 }
 0x2f8   :  { %v992_v19 = vmul.f32 %v1039_v17, %v982_v10  ;;  %v993_v20 = vmul.f32 %v1039_v17, %v983_v12  ;;  %v994_v21 = vmul.f32 %v1039_v17, %v984_v13  ;;  %v995_v22 = vmul.f32 %v1039_v17, %v985_v24 }
 0x2f9   :  { %v996_v23 = vmul.f32 %v1039_v17, %v986_v16  ;;  %v997_v25 = vmul.f32 %v1039_v17, %v987_v18 }
 0x2fa   :  { %v1002_v26 = vadd.f32 %v1040_v15, %v992_v19  ;;  %v1003_v27 = vadd.f32 %v1040_v15, %v993_v20  ;;  %v1004_v28 = vadd.f32 %v1040_v15, %v994_v21  ;;  %v1005_v29 = vadd.f32 %v1040_v15, %v995_v22 }
 0x2fb   :  { %v1006_v30 = vadd.f32 %v1040_v15, %v996_v23  ;;  %v1007_v32 = vadd.f32 %v1040_v15, %v997_v25 }
 0x2fc   :  { %v1008_v34 = vadd.f32 %v1002_v26, %v1704_v9  ;;  %v1009_v35 = vadd.f32 %v1003_v27, %v1710_v31  ;;  %v1010_v39 = vadd.f32 %v1004_v28, %v1715_v33  ;;  %v1011_v41 = vadd.f32 %v1005_v29, %v1729_v38 }
 0x2fd   :  { %v1012_v42 = vadd.f32 %v1006_v30, %v1734_v40  ;;  %v1013_v43 = vadd.f32 %v1007_v32, %v1720_v36 }
 0x2fe   :  { %v1014_v44 = vmax.f32 %v1008_v34, 0.0  ;;  %v1015_v45 = vmax.f32 %v1009_v35, 0.0  ;;  %v1016_v46 = vmax.f32 %v1010_v39, 0.0  ;;  %v1017_v47 = vmax.f32 %v1011_v41, 0.0 }
 0x2ff   :  { %v1018_v48 = vmax.f32 %v1012_v42, 0.0  ;;  %v1019_v49 = vmax.f32 %v1013_v43, 0.0 }
 0x300   :  { %1020 = vst [vmem:[%s1938_s3] sm:$0xff] %v1014_v44  ;;  %1021 = vst [vmem:[%s1938_s3 + $0x8] sm:$0xff] %v1015_v45 }
 0x301   :  { %1022 = vst [vmem:[%s1938_s3 + $0x10] sm:$0xff] %v1016_v46  ;;  %1023 = vst [vmem:[%s1938_s3 + $0x18] sm:$0xff] %v1017_v47 }
 0x302   :  { %1024 = vst [vmem:[%s1938_s3 + $0x20] sm:$0xff] %v1018_v48  ;;  %1025 = vst [vmem:[%s1938_s3 + $0x28] sm:$0xff] %v1019_v49 }
 0x303   :  { %1030 = vsyncpa [#allocation3], 1 }

</bundles_post_ra>
